<compile_context>
chip_gen: v5e
topology: v5e:2x2
jax: 0.10.0
libtpu: 0.0.40
codegen_flags: <defaults>
</compile_context>

<pallas_src>
import jax
import jax.numpy as jnp
from jax import lax
from jax.experimental import pallas as pl
from jax.experimental.pallas import tpu as pltpu


# ----------------------------------------------------------------------------
# Pallas kernel: fused LayerNorm(C) + (X @ W + b)
# ----------------------------------------------------------------------------
def _ln_linear_kernel(x_ref, g_ref, bln_ref, w_ref, b_ref, o_ref):
    x = x_ref[...].astype(jnp.float32)
    mu = jnp.mean(x, axis=-1, keepdims=True)
    xc = x - mu
    var = jnp.mean(xc * xc, axis=-1, keepdims=True)
    xn = xc * lax.rsqrt(var + 1e-5) * g_ref[...] + bln_ref[...]
    y = jnp.dot(xn, w_ref[...], preferred_element_type=jnp.float32) + b_ref[...]
    o_ref[...] = y.astype(o_ref.dtype)


def fused_layernorm_linear(x2d, gamma, beta, w, b):
    """y = LayerNorm(x2d) @ w + b.   x2d: (M, C), w: (C, N), b: (N,)."""
    M, C = x2d.shape
    N = w.shape[1]
    # Row-tile size: biggest standard tile the row count justifies; pad M up to
    # a multiple of TM so the grid is fully tiled (no unpipelined TM=M fallback).
    if M >= 512:
        TM = 512
    elif M >= 256:
        TM = 256
    else:
        TM = 128
    Mp = ((M + TM - 1) // TM) * TM
    if Mp != M:
        x2d = jnp.pad(x2d, ((0, Mp - M), (0, 0)))

    out = pl.pallas_call(
        _ln_linear_kernel,
        out_shape=jax.ShapeDtypeStruct((Mp, N), x2d.dtype),
        grid=(Mp // TM,),
        in_specs=[
            pl.BlockSpec((TM, C), lambda i: (i, 0)),   # activations (tiled over rows)
            pl.BlockSpec((1, C), lambda i: (0, 0)),    # LN gamma  (resident)
            pl.BlockSpec((1, C), lambda i: (0, 0)),    # LN beta   (resident)
            pl.BlockSpec((C, N), lambda i: (0, 0)),    # up-weight (resident)
            pl.BlockSpec((1, N), lambda i: (0, 0)),    # up-bias   (resident)
        ],
        out_specs=pl.BlockSpec((TM, N), lambda i: (i, 0)),
        compiler_params=pltpu.CompilerParams(
            dimension_semantics=("parallel",),          # megacore-shardable when >=2 tiles
            vmem_limit_bytes=32 * 1024 * 1024,          # safe on v5e/v6e/v7x
        ),
    )(x2d, gamma.reshape(1, C), beta.reshape(1, C), w, b.reshape(1, N))
    return out[:M] if Mp != M else out


# ----------------------------------------------------------------------------
# Patch_Expanding forward
# ----------------------------------------------------------------------------
def patch_expanding_forward(p, x, S, H, W):
    B, L, C = x.shape
    assert L == S * H * W, "input feature has wrong size"
    cout = C // 2
    k0, k1, k2 = p["kernel"]

    # LayerNorm + ConvTranspose3d(stride==kernel) as one fused matmul.
    y = fused_layernorm_linear(x.reshape(B * L, C),
                               p["norm_g"], p["norm_b"], p["w_mat"], p["b_vec"])

    # Columns are ordered (ks, kh, kw, cout) -> Cout stays the minor (lane) dim,
    # so this interleave never moves the minor axis.
    # TODO(synk): the block-to-space scatter (token -> k0*k1*k2 strided output rows)
    # is not a rectangular BlockSpec mapping, so it stays as one XLA transpose.
    y = y.reshape(B, S, H, W, k0, k1, k2, cout)
    y = jnp.transpose(y, (0, 1, 4, 2, 5, 3, 6, 7)).reshape(B, S * k0, H * k1, W * k2, cout)

    if p["output_padding_s"]:
        # ConvTranspose3d output_padding=[1,0,0]: extra trailing S-slab is bias-only.
        slab = jnp.broadcast_to(p["up_b"].astype(y.dtype), (B, 1, H * k1, W * k2, cout))
        y = jnp.concatenate([y, slab], axis=1)

    return y.reshape(B, -1, cout)


# Pure-JAX reference (direct transposed-conv semantics) for correctness check.
def patch_expanding_ref(p, x, S, H, W):
    B, L, C = x.shape
    cout = C // 2
    k0, k1, k2 = p["kernel"]
    xf = x.reshape(B, S, H, W, C).astype(jnp.float32)
    mu = jnp.mean(xf, axis=-1, keepdims=True)
    var = jnp.mean((xf - mu) ** 2, axis=-1, keepdims=True)
    xn = (xf - mu) / jnp.sqrt(var + 1e-5) * p["norm_g"] + p["norm_b"]
    y = jnp.einsum("bshwc,coijk->bsihjwko", xn, p["up_w"].astype(jnp.float32)) + p["up_b"]
    y = y.reshape(B, S * k0, H * k1, W * k2, cout)
    if p["output_padding_s"]:
        slab = jnp.broadcast_to(p["up_b"], (B, 1, H * k1, W * k2, cout)).astype(y.dtype)
        y = jnp.concatenate([y, slab], axis=1)
    return y.reshape(B, -1, cout)


# ----------------------------------------------------------------------------
# Deterministic parameter construction
# ----------------------------------------------------------------------------
def build_patch_expanding_params(key, dim, tag):
    cout = dim // 2
    k = (1, 2, 2) if tag == 0 else (2, 2, 2)
    kw, kb, kg, kbt = jax.random.split(key, 4)
    # PyTorch ConvTranspose3d weight layout: (Cin, Cout, kD, kH, kW)
    up_w = jax.random.normal(kw, (dim, cout) + k, jnp.float32) * 0.02
    up_b = jax.random.normal(kb, (cout,), jnp.float32) * 0.02
    norm_g = 1.0 + 0.1 * jax.random.normal(kg, (dim,), jnp.float32)
    norm_b = 0.02 * jax.random.normal(kbt, (dim,), jnp.float32)
    # Matmul layout, column order (ks, kh, kw, cout) — precomputed once here so the
    # forward never re-emits the weight transpose; keeps Cout as the lane dim.
    w_mat = jnp.transpose(up_w, (0, 2, 3, 4, 1)).reshape(dim, k[0] * k[1] * k[2] * cout)
    b_vec = jnp.tile(up_b, k[0] * k[1] * k[2])
    return dict(norm_g=norm_g, norm_b=norm_b, w_mat=w_mat, b_vec=b_vec,
                up_w=up_w, up_b=up_b, kernel=k, output_padding_s=(tag == 2))


# ----------------------------------------------------------------------------
if __name__ == "__main__":
    key = jax.random.PRNGKey(0)
    kpA, kxA, kpB, kxB = jax.random.split(key, 4)
    B = 2

    # Instance A: tag=2 -> kernel/stride [2,2,2], output_padding=[1,0,0]
    dimA, SA, HA, WA = 16, 3, 4, 4
    pA = build_patch_expanding_params(kpA, dimA, tag=2)
    xA = jax.random.normal(kxA, (B, SA * HA * WA, dimA), jnp.float32)
    outA = patch_expanding_forward(pA, xA, SA, HA, WA)
    refA = patch_expanding_ref(pA, xA, SA, HA, WA)

    # Instance B: tag=0 -> kernel/stride [1,2,2]  (multi-tile grid path: M=768)
    dimB, SB, HB, WB = 8, 6, 8, 8
    pB = build_patch_expanding_params(kpB, dimB, tag=0)
    xB = jax.random.normal(kxB, (B, SB * HB * WB, dimB), jnp.float32)
    outB = patch_expanding_forward(pB, xB, SB, HB, WB)
    refB = patch_expanding_ref(pB, xB, SB, HB, WB)

    jax.block_until_ready((outA, outB))

    assert outA.shape == (B, (SA * 2 + 1) * (HA * 2) * (WA * 2), dimA // 2)
    assert outB.shape == (B, SB * (HB * 2) * (WB * 2), dimB // 2)
    assert bool(jnp.all(jnp.isfinite(outA))) and bool(jnp.all(jnp.isfinite(outB)))
    assert bool(jnp.allclose(outA, refA, rtol=1e-4, atol=1e-4))
    assert bool(jnp.allclose(outB, refB, rtol=1e-4, atol=1e-4))
    print("KERNEL_OK")
</pallas_src>

<mosaic_0001>
module attributes {stable_mosaic.version = 11 : i64} {
  func.func @_ln_linear_kernel(%arg0: i32, %arg1: memref<128x16xf32, #tpu.memory_space<vmem>>, %arg2: memref<1x16xf32, #tpu.memory_space<vmem>>, %arg3: memref<1x16xf32, #tpu.memory_space<vmem>>, %arg4: memref<16x64xf32, #tpu.memory_space<vmem>>, %arg5: memref<1x64xf32, #tpu.memory_space<vmem>>, %arg6: memref<128x64xf32, #tpu.memory_space<vmem>>) attributes {dimension_semantics = [#tpu.dimension_semantics<parallel>], iteration_bounds = array<i64: 1>, scalar_prefetch = 0 : i64, scratch_operands = 0 : i64, tpu.core_type = #tpu.core_type<tc>, window_params = [{transform_indices = @transform_0, window_bounds = array<i64: 128, 16>}, {pipeline_mode = #tpu.pipeline_mode<synchronous>, transform_indices = @transform_1, window_bounds = array<i64: 1, 16>}, {pipeline_mode = #tpu.pipeline_mode<synchronous>, transform_indices = @transform_2, window_bounds = array<i64: 1, 16>}, {pipeline_mode = #tpu.pipeline_mode<synchronous>, transform_indices = @transform_3, window_bounds = array<i64: 16, 64>}, {pipeline_mode = #tpu.pipeline_mode<synchronous>, transform_indices = @transform_4, window_bounds = array<i64: 1, 64>}, {transform_indices = @transform_5, window_bounds = array<i64: 128, 64>}]} {
    %c0 = arith.constant 0 : index
    %c0_0 = arith.constant 0 : index
    %0 = vector.load %arg1[%c0, %c0_0] : memref<128x16xf32, #tpu.memory_space<vmem>>, vector<128x16xf32>
    %cst = arith.constant dense<0.000000e+00> : vector<128xf32>
    %1 = vector.multi_reduction <add>, %0, %cst [1] : vector<128x16xf32> to vector<128xf32>
    %2 = vector.shape_cast %1 : vector<128xf32> to vector<128x1xf32>
    %cst_1 = arith.constant 1.600000e+01 : f32
    %3 = vector.broadcast %cst_1 : f32 to vector<128x1xf32>
    %4 = arith.divf %2, %3 : vector<128x1xf32>
    %5 = vector.broadcast %4 : vector<128x1xf32> to vector<128x16xf32>
    %6 = arith.subf %0, %5 : vector<128x16xf32>
    %7 = arith.mulf %6, %6 : vector<128x16xf32>
    %cst_2 = arith.constant dense<0.000000e+00> : vector<128xf32>
    %8 = vector.multi_reduction <add>, %7, %cst_2 [1] : vector<128x16xf32> to vector<128xf32>
    %9 = vector.shape_cast %8 : vector<128xf32> to vector<128x1xf32>
    %cst_3 = arith.constant 1.600000e+01 : f32
    %10 = vector.broadcast %cst_3 : f32 to vector<128x1xf32>
    %11 = arith.divf %9, %10 : vector<128x1xf32>
    %cst_4 = arith.constant 9.99999974E-6 : f32
    %12 = vector.broadcast %cst_4 : f32 to vector<128x1xf32>
    %13 = arith.addf %11, %12 : vector<128x1xf32>
    %14 = math.rsqrt %13 : vector<128x1xf32>
    %15 = vector.broadcast %14 : vector<128x1xf32> to vector<128x16xf32>
    %16 = arith.mulf %6, %15 : vector<128x16xf32>
    %c0_5 = arith.constant 0 : index
    %c0_6 = arith.constant 0 : index
    %17 = vector.load %arg2[%c0_5, %c0_6] : memref<1x16xf32, #tpu.memory_space<vmem>>, vector<1x16xf32>
    %18 = vector.broadcast %17 : vector<1x16xf32> to vector<128x16xf32>
    %19 = arith.mulf %16, %18 : vector<128x16xf32>
    %c0_7 = arith.constant 0 : index
    %c0_8 = arith.constant 0 : index
    %20 = vector.load %arg3[%c0_7, %c0_8] : memref<1x16xf32, #tpu.memory_space<vmem>>, vector<1x16xf32>
    %21 = vector.broadcast %20 : vector<1x16xf32> to vector<128x16xf32>
    %22 = arith.addf %19, %21 : vector<128x16xf32>
    %c0_9 = arith.constant 0 : index
    %c0_10 = arith.constant 0 : index
    %23 = vector.load %arg4[%c0_9, %c0_10] : memref<16x64xf32, #tpu.memory_space<vmem>>, vector<16x64xf32>
    %cst_11 = arith.constant dense<0.000000e+00> : vector<128x64xf32>
    %24 = tpu.matmul %22, %23, %cst_11 {dimension_numbers = #tpu.dot_dimension_numbers<[1], [0], [0], [1], [0, 0, 1, 1], [], []>} : vector<128x16xf32>, vector<16x64xf32>, vector<128x64xf32> -> vector<128x64xf32>
    %c0_12 = arith.constant 0 : index
    %c0_13 = arith.constant 0 : index
    %25 = vector.load %arg5[%c0_12, %c0_13] : memref<1x64xf32, #tpu.memory_space<vmem>>, vector<1x64xf32>
    %26 = vector.broadcast %25 : vector<1x64xf32> to vector<128x64xf32>
    %27 = arith.addf %24, %26 : vector<128x64xf32>
    %c0_14 = arith.constant 0 : index
    %c0_15 = arith.constant 0 : index
    %28 = vector.load %arg6[%c0_14, %c0_15] : memref<128x64xf32, #tpu.memory_space<vmem>>, vector<128x64xf32>
    tpu.vector_store %arg6[%c0_14, %c0_15], %27 {strides = array<i32>} : memref<128x64xf32, #tpu.memory_space<vmem>>, vector<128x64xf32>,
    return
  }
  func.func @transform_0(%arg0: i32) -> (i32, i32) {
    %c0_i32 = arith.constant 0 : i32
    %c0_i32_0 = arith.constant 0 : i32
    return %arg0, %c0_i32 : i32, i32
  }
  func.func @transform_1(%arg0: i32) -> (i32, i32) {
    %c0_i32 = arith.constant 0 : i32
    %c0_i32_0 = arith.constant 0 : i32
    %c0_i32_1 = arith.constant 0 : i32
    return %c0_i32, %c0_i32_0 : i32, i32
  }
  func.func @transform_2(%arg0: i32) -> (i32, i32) {
    %c0_i32 = arith.constant 0 : i32
    %c0_i32_0 = arith.constant 0 : i32
    %c0_i32_1 = arith.constant 0 : i32
    return %c0_i32, %c0_i32_0 : i32, i32
  }
  func.func @transform_3(%arg0: i32) -> (i32, i32) {
    %c0_i32 = arith.constant 0 : i32
    %c0_i32_0 = arith.constant 0 : i32
    %c0_i32_1 = arith.constant 0 : i32
    return %c0_i32, %c0_i32_0 : i32, i32
  }
  func.func @transform_4(%arg0: i32) -> (i32, i32) {
    %c0_i32 = arith.constant 0 : i32
    %c0_i32_0 = arith.constant 0 : i32
    %c0_i32_1 = arith.constant 0 : i32
    return %c0_i32, %c0_i32_0 : i32, i32
  }
  func.func @transform_5(%arg0: i32) -> (i32, i32) {
    %c0_i32 = arith.constant 0 : i32
    %c0_i32_0 = arith.constant 0 : i32
    return %arg0, %c0_i32 : i32, i32
  }
}

</mosaic_0001>

<bundles_post_ra>
// kernel: tpu_custom_call.1
= control target key start
LH: loop header
LB: loop body
LE: loop exit
PB: predicated region body
PF: predicated region fallthrough
CT: control target
= control target key end

     0   :  { %vm36_vm0 = vcmask 130048   ;;  %v636_v32 = vmov 16.0   ;;  %s1361_s0 = inlined_call_operand.vmem [shape: f32[128,16], index: 0, kind: input, shape index: {}]   ;;  %s1362_s1 = inlined_call_operand.vmem [shape: f32[1,16], index: 1, kind: input, shape index: {}]   ;;  %s1363_s2 = inlined_call_operand.vmem [shape: f32[1,16], index: 2, kind: input, shape index: {}]   ;;  %s1364_s4 = inlined_call_operand.vmem [shape: f32[1,64], index: 4, kind: input, shape index: {}]   ;;  %s1365_s3 = inlined_call_operand.vmem [shape: f32[16,64], index: 3, kind: input, shape index: {}]   ;;  %s1366_s5 = inlined_call_operand.vmem [shape: f32[128,64], index: 5, kind: output, shape index: {}]  }
   0x1   :  { %v670_v0 = vld [vmem:[%s1361_s0 + $0x48] sm:$0xff]  ;;  %v28_v1 = vld [vmem:[%s1361_s0 + $0x40] sm:$0xff]  ;;  %v706_v12 = vld [vmem:[%s1361_s0 + $0x50] sm:$0xff]  ;;  %602 = vrcp.f32 %v636_v32 }
   0x2   :  { %v20_v2 = vld [vmem:[%s1361_s0] sm:$0xff]  ;;  %v64_v3 = vsel %vm36_vm0, %v670_v0, 0.0  ;;  %v61_v4 = vsel %vm36_vm0, %v28_v1, 0.0  ;;  %v685_v6 = vld [vmem:[%s1361_s0 + $0x68] sm:$0xff]  ;;  %v67_v15 = vsel %vm36_vm0, %v706_v12, 0.0  ;;  %v727_v18 = vld [vmem:[%s1361_s0 + $0x30] sm:$0xff] }
   0x3   :  { %v37_v5 = vsel %vm36_vm0, %v20_v2, 0.0  ;;  %65 = vadd.xlane.f32.xlu2 %v64_v3  ;;  %62 = vadd.xlane.f32.xlu0 %v61_v4  ;;  %v690_v7 = vld [vmem:[%s1361_s0 + $0x60] sm:$0xff]  ;;  %v76_v9 = vsel %vm36_vm0, %v685_v6, 0.0  ;;  %v711_v13 = vld [vmem:[%s1361_s0 + $0x8] sm:$0xff]  ;;  %v732_v19 = vld [vmem:[%s1361_s0 + $0x70] sm:$0xff]  ;;  %v55_v21 = vsel %vm36_vm0, %v727_v18, 0.0 }
   0x4   :  { %38 = vadd.xlane.f32.xlu1 %v37_v5  ;;  %v695_v8 = vld [vmem:[%s1361_s0 + $0x20] sm:$0xff]  ;;  %v73_v10 = vsel %vm36_vm0, %v690_v7, 0.0  ;;  %v716_v14 = vld [vmem:[%s1361_s0 + $0x28] sm:$0xff]  ;;  %v40_v16 = vsel %vm36_vm0, %v711_v13, 0.0  ;;  %v737_v20 = vld [vmem:[%s1361_s0 + $0x10] sm:$0xff]  ;;  %v79_v22 = vsel %vm36_vm0, %v732_v19, 0.0 }
   0x5   :  { %v49_v11 = vsel %vm36_vm0, %v695_v8, 0.0  ;;  %v52_v17 = vsel %vm36_vm0, %v716_v14, 0.0  ;;  %v43_v23 = vsel %vm36_vm0, %v737_v20, 0.0  ;;  %v748_v24 = vld [vmem:[%s1361_s0 + $0x18] sm:$0xff] }
   0x6   :  { %v753_v25 = vld [vmem:[%s1361_s0 + $0x58] sm:$0xff]  ;;  %v46_v27 = vsel %vm36_vm0, %v748_v24, 0.0 }
   0x7   :  { %v758_v26 = vld [vmem:[%s1361_s0 + $0x78] sm:$0xff]  ;;  %v70_v28 = vsel %vm36_vm0, %v753_v25, 0.0  ;;  %v603_v33 = vpop.eup %602 }
   0x8   :  { %v82_v29 = vsel %vm36_vm0, %v758_v26, 0.0  ;;  %v769_v30 = vld [vmem:[%s1361_s0 + $0x38] sm:$0xff]  ;;  %v86_v34 = vmul.f32 16.0, %v603_v33  ;;  %vm90_vm1 = vweird.f32 %v603_v33 }
   0x9   :  { %v58_v31 = vsel %vm36_vm0, %v769_v30, 0.0 }
   0xa   :  { %v87_v35 = vsub.f32 1.0, %v86_v34 }
   0xb   :  { %77 = vadd.xlane.f32.xlu2 %v76_v9  ;;  %74 = vadd.xlane.f32.xlu0 %v73_v10 }
   0xc   :  { %50 = vadd.xlane.f32.xlu1 %v49_v11  ;;  %v88_v36 = vmul.f32 %v603_v33, %v87_v35 }
   0xe   :  { %v89_v37 = vadd.f32 %v603_v33, %v88_v36 }
  0x10   :  { %v773_v38 = vsel %vm90_vm1, %v603_v33, %v89_v37 }
  0x13   :  { %68 = vadd.xlane.f32.xlu2 %v67_v15  ;;  %41 = vadd.xlane.f32.xlu0 %v40_v16 }
  0x14   :  { %53 = vadd.xlane.f32.xlu1 %v52_v17 }
  0x1b   :  { %56 = vadd.xlane.f32.xlu2 %v55_v21  ;;  %80 = vadd.xlane.f32.xlu0 %v79_v22 }
  0x1c   :  { %44 = vadd.xlane.f32.xlu1 %v43_v23 }
  0x23   :  { %47 = vadd.xlane.f32.xlu2 %v46_v27  ;;  %71 = vadd.xlane.f32.xlu0 %v70_v28 }
  0x24   :  { %83 = vadd.xlane.f32.xlu1 %v82_v29 }
  0x2b   :  { %59 = vadd.xlane.f32.xlu0 %v58_v31 }
  0x76   :  { %v66_v39 = vpop.xlane.xlu2 %65  ;;  %v63_v40 = vpop.xlane.xlu0 %62 }
  0x77   :  { %v100_v41 = vmul.f32 %v773_v38, %v63_v40  ;;  %v39_v42 = vpop.xlane.xlu1 %38  ;;  %v101_v56 = vmul.f32 %v773_v38, %v66_v39 }
  0x78   :  { %v92_v43 = vmul.f32 %v773_v38, %v39_v42 }
  0x79   :  { %v777_v44 = vsub.f32 %v28_v1, %v100_v41  ;;  %v807_v63 = vsub.f32 %v670_v0, %v101_v56 }
  0x7a   :  { %v779_v45 = vsub.f32 %v20_v2, %v92_v43 }
  0x7b   :  { %v132_v46 = vmul.f32 %v777_v44, %v777_v44  ;;  %v133_v11 = vmul.f32 %v807_v63, %v807_v63 }
  0x7c   :  { %v124_v47 = vmul.f32 %v779_v45, %v779_v45 }
  0x7d   :  { %v164_v48 = vsel %vm36_vm0, %v132_v46, 0.0  ;;  %v167_v21 = vsel %vm36_vm0, %v133_v11, 0.0 }
  0x7e   :  { %v78_v49 = vpop.xlane.xlu2 %77  ;;  %v75_v50 = vpop.xlane.xlu0 %74  ;;  %165 = vadd.xlane.f32.xlu1 %v164_v48  ;;  %v140_v51 = vsel %vm36_vm0, %v124_v47, 0.0 }
  0x7f   :  { %v105_v52 = vmul.f32 %v773_v38, %v78_v49  ;;  %v104_v53 = vmul.f32 %v773_v38, %v75_v50  ;;  %141 = vadd.xlane.f32.xlu0 %v140_v51  ;;  %v51_v54 = vpop.xlane.xlu1 %50 }
  0x80   :  { %v96_v55 = vmul.f32 %v773_v38, %v51_v54 }
  0x81   :  { %v792_v57 = vsub.f32 %v685_v6, %v105_v52  ;;  %v795_v58 = vsub.f32 %v690_v7, %v104_v53 }
  0x82   :  { %v798_v59 = vsub.f32 %v695_v8, %v96_v55 }
  0x83   :  { %v136_v60 = vmul.f32 %v795_v58, %v795_v58  ;;  %v137_v61 = vmul.f32 %v792_v57, %v792_v57 }
  0x84   :  { %v128_v62 = vmul.f32 %v798_v59, %v798_v59 }
  0x85   :  { %v176_v1 = vsel %vm36_vm0, %v136_v60, 0.0  ;;  %v179_v2 = vsel %vm36_vm0, %v137_v61, 0.0 }
  0x86   :  { %v69_v3 = vpop.xlane.xlu2 %68  ;;  %177 = vadd.xlane.f32.xlu2 %v176_v1  ;;  %v42_v4 = vpop.xlane.xlu0 %41  ;;  %v152_v5 = vsel %vm36_vm0, %v128_v62, 0.0  ;;  %v437_v62 = vld [vmem:[%s1365_s3 + $0x8] sm:$0xff] }
  0x87   :  { %v102_v6 = vmul.f32 %v773_v38, %v69_v3  ;;  %v93_v7 = vmul.f32 %v773_v38, %v42_v4  ;;  %180 = vadd.xlane.f32.xlu0 %v179_v2  ;;  %153 = vadd.xlane.f32.xlu1 %v152_v5  ;;  %v54_v8 = vpop.xlane.xlu1 %53 }
  0x88   :  { %v97_v9 = vmul.f32 %v773_v38, %v54_v8  ;;  %504 = vmatpush.msra.mxu0 %v437_v62  ;;  %593 = vmatpush.msra.mxu2 %v437_v62 }
  0x89   :  { %v816_v0 = vsub.f32 %v706_v12, %v102_v6  ;;  %v819_v10 = vsub.f32 %v711_v13, %v93_v7  ;;  %592 = vmatpush.msra.mxu1 %v437_v62  ;;  %594 = vmatpush.msra.mxu3 %v437_v62 }
  0x8a   :  { %v828_v17 = vsub.f32 %v716_v14, %v97_v9 }
  0x8b   :  { %v134_v15 = vmul.f32 %v816_v0, %v816_v0  ;;  %v125_v16 = vmul.f32 %v819_v10, %v819_v10 }
  0x8c   :  { %v129_v29 = vmul.f32 %v828_v17, %v828_v17 }
  0x8d   :  { %v170_v12 = vsel %vm36_vm0, %v134_v15, 0.0  ;;  %v143_v22 = vsel %vm36_vm0, %v125_v16, 0.0 }
  0x8e   :  { %v57_v13 = vpop.xlane.xlu2 %56  ;;  %168 = vadd.xlane.f32.xlu2 %v167_v21  ;;  %v81_v23 = vpop.xlane.xlu0 %80  ;;  %v155_v36 = vsel %vm36_vm0, %v129_v29, 0.0 }
  0x8f   :  { %v98_v27 = vmul.f32 %v773_v38, %v57_v13  ;;  %v106_v28 = vmul.f32 %v773_v38, %v81_v23  ;;  %171 = vadd.xlane.f32.xlu0 %v170_v12  ;;  %144 = vadd.xlane.f32.xlu1 %v143_v22  ;;  %v45_v14 = vpop.xlane.xlu1 %44 }
  0x90   :  { %v94_v31 = vmul.f32 %v773_v38, %v45_v14 }
  0x91   :  { %v839_v32 = vsub.f32 %v727_v18, %v98_v27  ;;  %v842_v33 = vsub.f32 %v732_v19, %v106_v28 }
  0x92   :  { %v850_v37 = vsub.f32 %v737_v20, %v94_v31 }
  0x93   :  { %v130_v34 = vmul.f32 %v839_v32, %v839_v32  ;;  %v138_v35 = vmul.f32 %v842_v33, %v842_v33 }
  0x94   :  { %v126_v43 = vmul.f32 %v850_v37, %v850_v37 }
  0x95   :  { %v158_v39 = vsel %vm36_vm0, %v130_v34, 0.0  ;;  %v182_v40 = vsel %vm36_vm0, %v138_v35, 0.0 }
  0x96   :  { %v48_v18 = vpop.xlane.xlu2 %47  ;;  %v72_v41 = vpop.xlane.xlu0 %71  ;;  %156 = vadd.xlane.f32.xlu2 %v155_v36  ;;  %v146_v51 = vsel %vm36_vm0, %v126_v43, 0.0 }
  0x97   :  { %v95_v19 = vmul.f32 %v773_v38, %v48_v18  ;;  %v103_v42 = vmul.f32 %v773_v38, %v72_v41  ;;  %159 = vadd.xlane.f32.xlu0 %v158_v39  ;;  %183 = vadd.xlane.f32.xlu1 %v182_v40  ;;  %v84_v46 = vpop.xlane.xlu1 %83 }
  0x98   :  { %v107_v20 = vmul.f32 %v773_v38, %v84_v46 }
  0x99   :  { %v860_v47 = vsub.f32 %v748_v24, %v95_v19  ;;  %v863_v48 = vsub.f32 %v753_v25, %v103_v42 }
  0x9a   :  { %v871_v52 = vsub.f32 %v758_v26, %v107_v20 }
  0x9b   :  { %v127_v49 = vmul.f32 %v860_v47, %v860_v47  ;;  %v135_v50 = vmul.f32 %v863_v48, %v863_v48 }
  0x9c   :  { %v139_v55 = vmul.f32 %v871_v52, %v871_v52 }
  0x9d   :  { %v149_v53 = vsel %vm36_vm0, %v127_v49, 0.0  ;;  %v173_v54 = vsel %vm36_vm0, %v135_v50, 0.0 }
  0x9e   :  { %v60_v24 = vpop.xlane.xlu0 %59  ;;  %147 = vadd.xlane.f32.xlu2 %v146_v51  ;;  %v185_v60 = vsel %vm36_vm0, %v139_v55, 0.0 }
  0x9f   :  { %v99_v25 = vmul.f32 %v773_v38, %v60_v24  ;;  %150 = vadd.xlane.f32.xlu0 %v149_v53  ;;  %174 = vadd.xlane.f32.xlu1 %v173_v54 }
  0xa1   :  { %v879_v56 = vsub.f32 %v769_v30, %v99_v25  ;;  %v436_v30 = vld [vmem:[%s1365_s3] sm:$0xff] }
  0xa2   :  { %505 = vmatpush.msra.mxu0 %v436_v30  ;;  %596 = vmatpush.msra.mxu2 %v436_v30 }
  0xa3   :  { %v131_v26 = vmul.f32 %v879_v56, %v879_v56  ;;  %595 = vmatpush.msra.mxu1 %v436_v30  ;;  %597 = vmatpush.msra.mxu3 %v436_v30 }
  0xa5   :  { %v161_v61 = vsel %vm36_vm0, %v131_v26, 0.0 }
  0xa6   :  { %186 = vadd.xlane.f32.xlu2 %v185_v60 }
  0xa7   :  { %162 = vadd.xlane.f32.xlu1 %v161_v61 }
  0xf1   :  { %v166_v1 = vpop.xlane.xlu1 %165 }
  0xf2   :  { %v142_v2 = vpop.xlane.xlu0 %141  ;;  %v196_v3 = vmul.f32 %v166_v1, %v773_v38 }
  0xf3   :  { %v188_v4 = vmul.f32 %v142_v2, %v773_v38 }
  0xf4   :  { %v212_v5 = vadd.f32 1e-05, %v196_v3 }
  0xf5   :  { %v204_v6 = vadd.f32 1e-05, %v188_v4 }
  0xf6   :  { %604 = vrsqrt.f32 %v212_v5  ;;  %vm306_vm6 = vweird.f32 %v212_v5 }
  0xf7   :  { %606 = vrsqrt.f32 %v204_v6  ;;  %vm226_vm2 = vweird.f32 %v204_v6 }
  0xf9   :  { %v178_v7 = vpop.xlane.xlu2 %177 }
  0xfa   :  { %v200_v8 = vmul.f32 %v178_v7, %v773_v38  ;;  %v181_v9 = vpop.xlane.xlu0 %180  ;;  %v154_v11 = vpop.xlane.xlu1 %153 }
  0xfb   :  { %v201_v15 = vmul.f32 %v181_v9, %v773_v38  ;;  %v192_v16 = vmul.f32 %v154_v11, %v773_v38 }
  0xfc   :  { %v896_v21 = vpop.eup %604  ;;  %v898_v12 = vadd.f32 1e-05, %v200_v8 }
  0xfd   :  { %v607_v22 = vpop.eup %606  ;;  %v301_v13 = vmul.f32 %v896_v21, %v212_v5  ;;  %v901_v23 = vadd.f32 1e-05, %v201_v15  ;;  %v903_v27 = vadd.f32 1e-05, %v192_v16  ;;  %vm307_vm4 = vweird.f32 %v896_v21 }
  0xfe   :  { %v221_v28 = vmul.f32 %v607_v22, %v204_v6  ;;  %608 = vrsqrt.f32 %v898_v12  ;;  %vm227_vm3 = vweird.f32 %v607_v22  ;;  %vm944_vm7 = vmor %vm306_vm6, %vm307_vm4  ;;  %vm346_vm8 = vweird.f32 %v898_v12 }
  0xff   :  { %v302_v29 = vmul.f32 %v896_v21, %v301_v13  ;;  %610 = vrsqrt.f32 %v901_v23  ;;  %vm935_vm5 = vmor %vm226_vm2, %vm227_vm3  ;;  %vm356_vm9 = vweird.f32 %v901_v23  ;;  %vm266_vm10 = vweird.f32 %v903_v27 }
 0x100   :  { %v222_v14 = vmul.f32 %v607_v22, %v221_v28  ;;  %612 = vrsqrt.f32 %v903_v27 }
 0x101   :  { %v303_v31 = vmul.f32 0.5, %v302_v29  ;;  %v169_v34 = vpop.xlane.xlu2 %168 }
 0x102   :  { %v223_v35 = vmul.f32 0.5, %v222_v14  ;;  %v197_v36 = vmul.f32 %v169_v34, %v773_v38  ;;  %v172_v39 = vpop.xlane.xlu0 %171  ;;  %v145_v40 = vpop.xlane.xlu1 %144  ;;  %v973_v34 = vld [vmem:[%s1362_s1] ss:$0 sm:$0xff] }
 0x103   :  { %v304_v18 = vsub.f32 1.5, %v303_v31  ;;  %v198_v41 = vmul.f32 %v172_v39, %v773_v38  ;;  %v189_v50 = vmul.f32 %v145_v40, %v773_v38 }
 0x104   :  { %v911_v19 = vpop.eup %608  ;;  %v224_v42 = vsub.f32 1.5, %v223_v35  ;;  %v913_v43 = vadd.f32 1e-05, %v197_v36 }
 0x105   :  { %v915_v46 = vpop.eup %610  ;;  %v341_v20 = vmul.f32 %v911_v19, %v898_v12  ;;  %v919_v49 = vadd.f32 1e-05, %v198_v41  ;;  %v305_v24 = vmul.f32 %v896_v21, %v304_v18  ;;  %v940_v1 = vadd.f32 1e-05, %v189_v50 }
 0x106   :  { %v922_v51 = vpop.eup %612  ;;  %v225_v53 = vmul.f32 %v607_v22, %v224_v42  ;;  %v351_v54 = vmul.f32 %v915_v46, %v901_v23  ;;  %614 = vrsqrt.f32 %v913_v43  ;;  %vm347_vm11 = vweird.f32 %v911_v19 }
 0x107   :  { %v342_v25 = vmul.f32 %v911_v19, %v341_v20  ;;  %v261_v55 = vmul.f32 %v922_v51, %v903_v27  ;;  %616 = vrsqrt.f32 %v919_v49  ;;  %v309_v5 = vsel %vm944_vm7, %v896_v21, %v305_v24  ;;  %vm1010_vm2 = vmor %vm346_vm8, %vm347_vm11 }
 0x108   :  { %v352_v26 = vmul.f32 %v915_v46, %v351_v54  ;;  %v229_v2 = vsel %vm935_vm5, %v607_v22, %v225_v53  ;;  %618 = vrsqrt.f32 %v940_v1  ;;  %v388_v35 = vmul.f32 %v309_v5, %v777_v44  ;;  %v987_v44 = vld [vmem:[%s1363_s2] ss:$0 sm:$0xff] }
 0x109   :  { %v343_v61 = vmul.f32 0.5, %v342_v25  ;;  %v262_v62 = vmul.f32 %v922_v51, %v261_v55  ;;  %v157_v30 = vpop.xlane.xlu2 %156  ;;  %v380_v28 = vmul.f32 %v229_v2, %v779_v45  ;;  %vm357_vm12 = vweird.f32 %v915_v46 }
 0x10a   :  { %v353_v4 = vmul.f32 0.5, %v352_v26  ;;  %v160_v6 = vpop.xlane.xlu0 %159  ;;  %v193_v7 = vmul.f32 %v157_v30, %v773_v38  ;;  %v184_v8 = vpop.xlane.xlu1 %183  ;;  %vm267_vm13 = vweird.f32 %v922_v51  ;;  %vm326_vm14 = vweird.f32 %v919_v49  ;;  %vm1022_vm3 = vmor %vm356_vm9, %vm357_vm12 }
 0x10b   :  { %v263_v9 = vmul.f32 0.5, %v262_v62  ;;  %v194_v15 = vmul.f32 %v160_v6, %v773_v38  ;;  %v344_v22 = vsub.f32 1.5, %v343_v61  ;;  %v202_v21 = vmul.f32 %v184_v8, %v773_v38  ;;  %vm1053_vm5 = vmor %vm266_vm10, %vm267_vm13 }
 0x10c   :  { %v954_v11 = vpop.eup %614  ;;  %v959_v16 = vadd.f32 1e-05, %v193_v7  ;;  %v354_v14 = vsub.f32 1.5, %v353_v4  ;;  %vm316_vm15 = vweird.f32 %v913_v43  ;;  %vm236_vm1 = vweird.f32 %v940_v1 }
 0x10d   :  { %v311_v13 = vmul.f32 %v954_v11, %v913_v43  ;;  %v965_v29 = vpop.eup %616  ;;  %v967_v31 = vadd.f32 1e-05, %v194_v15  ;;  %v264_v36 = vsub.f32 1.5, %v263_v9  ;;  %v992_v18 = vmul.f32 %v911_v19, %v344_v22 }
 0x10e   :  { %620 = vrsqrt.f32 %v959_v16  ;;  %v321_v45 = vmul.f32 %v965_v29, %v919_v49  ;;  %v989_v40 = vpop.eup %618  ;;  %v996_v20 = vadd.f32 1e-05, %v202_v21  ;;  %v999_v53 = vmul.f32 %v915_v46, %v354_v14 }
 0x10f   :  { %v312_v39 = vmul.f32 %v954_v11, %v311_v13  ;;  %622 = vrsqrt.f32 %v967_v31  ;;  %v231_v54 = vmul.f32 %v989_v40, %v940_v1  ;;  %v400_v24 = vmul.f32 %v973_v34, %v380_v28 }
 0x110   :  { %v322_v42 = vmul.f32 %v965_v29, %v321_v45  ;;  %v408_v25 = vmul.f32 %v973_v34, %v388_v35  ;;  %v265_v61 = vmul.f32 %v922_v51, %v264_v36  ;;  %624 = vrsqrt.f32 %v996_v20 }
 0x111   :  { %v313_v41 = vmul.f32 0.5, %v312_v39  ;;  %v148_v50 = vpop.xlane.xlu2 %147  ;;  %v232_v12 = vmul.f32 %v989_v40, %v231_v54  ;;  %v420_v4 = vadd.f32 %v987_v44, %v400_v24  ;;  %v349_v8 = vsel %vm1010_vm2, %v911_v19, %v992_v18 }
 0x112   :  { %v151_v55 = vpop.xlane.xlu0 %150  ;;  %v175_v26 = vpop.xlane.xlu1 %174  ;;  %v323_v30 = vmul.f32 0.5, %v322_v42  ;;  %v428_v6 = vadd.f32 %v987_v44, %v408_v25  ;;  %vm317_vm4 = vweird.f32 %v954_v11  ;;  %v190_v13 = vmul.f32 %v148_v50, %v773_v38 }
 0x113   :  { %v314_v62 = vsub.f32 1.5, %v313_v41  ;;  %v191_v7 = vmul.f32 %v151_v55, %v773_v38  ;;  %v233_v15 = vmul.f32 0.5, %v232_v12  ;;  %576 = vmatmul.msk.f32.vlgmr.msra.gmra.mxu0 %vm36_vm0, %v420_v4  ;;  %v199_v21 = vmul.f32 %v175_v26, %v773_v38  ;;  %vm1081_vm9 = vmor %vm316_vm15, %vm317_vm4 }
 0x114   :  { %v1016_v2 = vpop.eup %620  ;;  %v324_v23 = vsub.f32 1.5, %v323_v30  ;;  %584 = vmatmul.msk.f32.vlgmr.msra.gmra.mxu2 %vm36_vm0, %v428_v6  ;;  %v359_v19 = vsel %vm1022_vm3, %v915_v46, %v999_v53  ;;  %vm327_vm6 = vweird.f32 %v965_v29  ;;  %v269_v36 = vsel %vm1053_vm5, %v922_v51, %v265_v61 }
 0x115   :  { %v271_v5 = vmul.f32 %v1016_v2, %v959_v16  ;;  %v1037_v9 = vpop.eup %622  ;;  %v1041_v22 = vadd.f32 1e-05, %v191_v7  ;;  %v1058_v14 = vmul.f32 %v954_v11, %v314_v62  ;;  %v234_v39 = vsub.f32 1.5, %v233_v15  ;;  %vm1099_vm10 = vmor %vm326_vm14, %vm327_vm6 }
 0x116   :  { %v281_v35 = vmul.f32 %v1037_v9, %v967_v31  ;;  %v1068_v27 = vpop.eup %624  ;;  %vm237_vm7 = vweird.f32 %v989_v40  ;;  %vm276_vm8 = vweird.f32 %v959_v16  ;;  %v1073_v41 = vadd.f32 1e-05, %v190_v13 }
 0x117   :  { %v272_v45 = vmul.f32 %v1016_v2, %v271_v5  ;;  %626 = vrsqrt.f32 %v1041_v22  ;;  %v1075_v42 = vadd.f32 1e-05, %v199_v21  ;;  %v1086_v50 = vmul.f32 %v965_v29, %v324_v23  ;;  %vm1112_vm13 = vmor %vm236_vm1, %vm237_vm7 }
 0x118   :  { %v282_v18 = vmul.f32 %v1037_v9, %v281_v35  ;;  %v235_v54 = vmul.f32 %v989_v40, %v234_v39  ;;  %v361_v25 = vmul.f32 %v1068_v27, %v996_v20  ;;  %v319_v26 = vsel %vm1081_vm9, %v954_v11, %v1058_v14 }
 0x119   :  { %v273_v24 = vmul.f32 0.5, %v272_v45  ;;  %v187_v55 = vpop.xlane.xlu2 %186  ;;  %vm277_vm11 = vweird.f32 %v1016_v2  ;;  %vm366_vm12 = vweird.f32 %v996_v20  ;;  %628 = vrsqrt.f32 %v1073_v41 }
 0x11a   :  { %v163_v60 = vpop.xlane.xlu1 %162  ;;  %v283_v61 = vmul.f32 0.5, %v282_v18  ;;  %v362_v30 = vmul.f32 %v1068_v27, %v361_v25  ;;  %630 = vrsqrt.f32 %v1075_v42  ;;  %vm286_vm14 = vweird.f32 %v967_v31  ;;  %vm1153_vm4 = vmor %vm276_vm8, %vm277_vm11 }
 0x11b   :  { %v274_v62 = vsub.f32 1.5, %v273_v24  ;;  %vm287_vm15 = vweird.f32 %v1037_v9  ;;  %v384_v11 = vmul.f32 %v269_v36, %v798_v59  ;;  %v392_v12 = vmul.f32 %v349_v8, %v795_v58 }
 0x11c   :  { %v203_v4 = vmul.f32 %v187_v55, %v773_v38  ;;  %v329_v1 = vsel %vm1099_vm10, %v965_v29, %v1086_v50  ;;  %v239_v7 = vsel %vm1112_vm13, %v989_v40, %v235_v54  ;;  %v363_v23 = vmul.f32 0.5, %v362_v30  ;;  %vm1202_vm11 = vmor %vm286_vm14, %vm287_vm15 }
 0x11d   :  { %v1121_v6 = vpop.eup %626  ;;  %v195_v5 = vmul.f32 %v163_v60, %v773_v38  ;;  %v275_v59 = vmul.f32 %v1016_v2, %v274_v62  ;;  %vm367_vm1 = vweird.f32 %v1068_v27  ;;  %vm256_vm2 = vweird.f32 %v1041_v22 }
 0x11e   :  { %v251_v58 = vmul.f32 %v1121_v6, %v1041_v22  ;;  %v404_v8 = vmul.f32 %v973_v34, %v384_v11  ;;  %v284_v15 = vsub.f32 1.5, %v283_v61  ;;  %v364_v13 = vsub.f32 1.5, %v363_v23  ;;  %vm1174_vm6 = vmor %vm366_vm12, %vm367_vm1 }
 0x11f   :  { %v412_v21 = vmul.f32 %v973_v34, %v392_v12  ;;  %v1138_v28 = vadd.f32 1e-05, %v203_v4  ;;  %v1140_v40 = vpop.eup %628  ;;  %v1144_v35 = vadd.f32 1e-05, %v195_v5  ;;  %v381_v36 = vmul.f32 %v239_v7, %v819_v10 }
 0x120   :  { %v252_v38 = vmul.f32 %v1121_v6, %v251_v58  ;;  %v424_v14 = vadd.f32 %v987_v44, %v404_v8  ;;  %v1147_v39 = vpop.eup %630  ;;  %v365_v18 = vmul.f32 %v1068_v27, %v364_v13  ;;  %v241_v51 = vmul.f32 %v1140_v40, %v1073_v41 }
 0x121   :  { %vm246_vm5 = vweird.f32 %v1073_v41  ;;  %v432_v54 = vadd.f32 %v987_v44, %v412_v21  ;;  %v279_v10 = vsel %vm1153_vm4, %v1016_v2, %v275_v59  ;;  %v331_v16 = vmul.f32 %v1147_v39, %v1075_v42 }
 0x122   :  { %v253_v24 = vmul.f32 0.5, %v252_v38  ;;  %580 = vmatmul.msk.f32.vlgmr.msra.gmra.mxu1 %vm36_vm0, %v424_v14  ;;  %632 = vrsqrt.f32 %v1138_v28  ;;  %v285_v25 = vmul.f32 %v1037_v9, %v284_v15  ;;  %v242_v2 = vmul.f32 %v1140_v40, %v241_v51 }
 0x123   :  { %vm336_vm7 = vweird.f32 %v1075_v42  ;;  %588 = vmatmul.msk.f32.vlgmr.msra.gmra.mxu3 %vm36_vm0, %v432_v54  ;;  %634 = vrsqrt.f32 %v1144_v35  ;;  %v369_v60 = vsel %vm1174_vm6, %v1068_v27, %v365_v18  ;;  %v332_v62 = vmul.f32 %v1147_v39, %v331_v16 }
 0x124   :  { %v254_v61 = vsub.f32 1.5, %v253_v24  ;;  %v401_v20 = vmul.f32 %v973_v34, %v381_v36  ;;  %v243_v30 = vmul.f32 0.5, %v242_v2  ;;  %v389_v49 = vmul.f32 %v319_v26, %v807_v63 }
 0x125   :  { %v393_v11 = vmul.f32 %v359_v19, %v792_v57  ;;  %v385_v12 = vmul.f32 %v279_v10, %v828_v17  ;;  %vm257_vm8 = vweird.f32 %v1121_v6  ;;  %vm247_vm9 = vweird.f32 %v1140_v40 }
 0x126   :  { %v333_v27 = vmul.f32 0.5, %v332_v62  ;;  %v421_v4 = vadd.f32 %v987_v44, %v401_v20  ;;  %v244_v3 = vsub.f32 1.5, %v243_v30  ;;  %v409_v57 = vmul.f32 %v973_v34, %v389_v49  ;;  %vm1217_vm12 = vmor %vm256_vm2, %vm257_vm8 }
 0x127   :  { %v413_v17 = vmul.f32 %v973_v34, %v393_v11  ;;  %v405_v46 = vmul.f32 %v973_v34, %v385_v12  ;;  %v255_v19 = vmul.f32 %v1121_v6, %v254_v61  ;;  %vm337_vm3 = vweird.f32 %v1147_v39  ;;  %vm248_vm13 = vmor %vm246_vm5, %vm247_vm9 }
 0x128   :  { %v633_v53 = vpop.eup %632  ;;  %v334_v26 = vsub.f32 1.5, %v333_v27  ;;  %577 = vmatmul.msk.f32.gmra.mxu0 %vm36_vm0, %v421_v4  ;;  %v394_v31 = vmul.f32 %v369_v60, %v842_v33  ;;  %v245_v5 = vmul.f32 %v1140_v40, %v244_v3  ;;  %v429_v58 = vadd.f32 %v987_v44, %v409_v57  ;;  %vm1245_vm10 = vmor %vm336_vm7, %vm337_vm3 }
 0x129   :  { %v635_v7 = vpop.eup %634  ;;  %v371_v59 = vmul.f32 %v633_v53, %v1138_v28  ;;  %v390_v33 = vmul.f32 %v329_v1, %v816_v0  ;;  %v289_v22 = vsel %vm1202_vm11, %v1037_v9, %v285_v25  ;;  %v433_v13 = vadd.f32 %v987_v44, %v413_v17 }
 0x12a   :  { %v335_v8 = vmul.f32 %v1147_v39, %v334_v26  ;;  %v291_v15 = vmul.f32 %v635_v7, %v1144_v35  ;;  %v249_v43 = vsel %vm248_vm13, %v1140_v40, %v245_v5  ;;  %585 = vmatmul.msk.f32.gmra.mxu2 %vm36_vm0, %v429_v58  ;;  %v425_v9 = vadd.f32 %v987_v44, %v405_v46 }
 0x12b   :  { %v372_v29 = vmul.f32 %v633_v53, %v371_v59  ;;  %589 = vmatmul.msk.f32.gmra.mxu3 %vm36_vm0, %v433_v13  ;;  %v414_v1 = vmul.f32 %v973_v34, %v394_v31  ;;  %v382_v42 = vmul.f32 %v249_v43, %v850_v37  ;;  %v259_v21 = vsel %vm1217_vm12, %v1121_v6, %v255_v19 }
 0x12c   :  { %v339_v41 = vsel %vm1245_vm10, %v1147_v39, %v335_v8  ;;  %v292_v50 = vmul.f32 %v635_v7, %v291_v15  ;;  %581 = vmatmul.msk.f32.gmra.mxu1 %vm36_vm0, %v425_v9  ;;  %v410_v38 = vmul.f32 %v973_v34, %v390_v33  ;;  %v386_v14 = vmul.f32 %v289_v22, %v839_v32 }
 0x12d   :  { %v373_v40 = vmul.f32 0.5, %v372_v29  ;;  %vm377_vm14 = vweird.f32 %v633_v53  ;;  %vm296_vm15 = vweird.f32 %v1144_v35  ;;  %v402_v39 = vmul.f32 %v973_v34, %v382_v42 }
 0x12e   :  { %v293_v36 = vmul.f32 0.5, %v292_v50  ;;  %vm297_vm1 = vweird.f32 %v635_v7  ;;  %v406_v37 = vmul.f32 %v973_v34, %v386_v14  ;;  %v391_v18 = vmul.f32 %v339_v41, %v863_v48 }
 0x12f   :  { %v374_v45 = vsub.f32 1.5, %v373_v40  ;;  %v434_v51 = vadd.f32 %v987_v44, %v414_v1  ;;  %v422_v54 = vadd.f32 %v987_v44, %v402_v39  ;;  %v383_v10 = vmul.f32 %v259_v21, %v860_v47  ;;  %vm298_vm5 = vmor %vm296_vm15, %vm297_vm1 }
 0x130   :  { %v294_v6 = vsub.f32 1.5, %v293_v36  ;;  %vm376_vm2 = vweird.f32 %v1138_v28  ;;  %v430_v24 = vadd.f32 %v987_v44, %v410_v38  ;;  %v426_v48 = vadd.f32 %v987_v44, %v406_v37 }
 0x131   :  { %v375_v32 = vmul.f32 %v633_v53, %v374_v45  ;;  %vm378_vm4 = vmor %vm376_vm2, %vm377_vm14  ;;  %578 = vmatmul.msk.f32.gmra.mxu0 %vm36_vm0, %v422_v54  ;;  %v411_v47 = vmul.f32 %v973_v34, %v391_v18  ;;  %v403_v28 = vmul.f32 %v973_v34, %v383_v10  ;;  %vm555_vm6 = vcmask 523264  }
 0x132   :  { %v295_v16 = vmul.f32 %v635_v7, %v294_v6  ;;  %586 = vmatmul.msk.f32.gmra.mxu2 %vm36_vm0, %v430_v24 }
 0x133   :  { %v379_v25 = vsel %vm378_vm4, %v633_v53, %v375_v32  ;;  %590 = vmatmul.msk.f32.gmra.mxu3 %vm36_vm0, %v434_v51  ;;  %v431_v61 = vadd.f32 %v987_v44, %v411_v47  ;;  %v423_v20 = vadd.f32 %v987_v44, %v403_v28 }
 0x134   :  { %v299_v55 = vsel %vm298_vm5, %v635_v7, %v295_v16  ;;  %v395_v2 = vmul.f32 %v379_v25, %v871_v52  ;;  %582 = vmatmul.msk.f32.gmra.mxu1 %vm36_vm0, %v426_v48  ;;  %v601_v52 = vld [vmem:[%s1364_s4] ss:$0 sm:$0xff] }
 0x135   :  { %v387_v60 = vmul.f32 %v299_v55, %v879_v56 }
 0x136   :  { %v415_v35 = vmul.f32 %v973_v34, %v395_v2 }
 0x137   :  { %v407_v62 = vmul.f32 %v973_v34, %v387_v60 }
 0x138   :  { %v435_v30 = vadd.f32 %v987_v44, %v415_v35 }
 0x139   :  { %v427_v49 = vadd.f32 %v987_v44, %v407_v62  ;;  %579 = vmatmul.msk.f32.gmra.mxu0 %vm36_vm0, %v423_v20 }
 0x13a   :  { %587 = vmatmul.msk.f32.gmra.mxu2 %vm36_vm0, %v431_v61 }
 0x13b   :  { %591 = vmatmul.msk.f32.gmra.mxu3 %vm36_vm0, %v435_v30 }
 0x13c   :  { %583 = vmatmul.msk.f32.gmra.mxu1 %vm36_vm0, %v427_v49 }
 0x190   :  { %v507_v56 = vpop.f32.mrf.mxu0 }
 0x191   :  { %v508_v34 = vadd.f32 %v601_v52, %v507_v56 }
 0x193   :  { %556 = vst.msk [vmem:[%s1366_s5] sm:$0xff] %vm555_vm6, %v508_v34 }
 0x197   :  { %v531_v44 = vpop.f32.mrf.mxu2 }
 0x198   :  { %v532_v11 = vadd.f32 %v601_v52, %v531_v44 }
 0x19a   :  { %564 = vst.msk [vmem:[%s1366_s5 + $0x40] sm:$0xff] %vm555_vm6, %v532_v11 }
 0x19f   :  { %v519_v12 = vpop.f32.mrf.mxu1 }
 0x1a0   :  { %v520_v27 = vadd.f32 %v601_v52, %v519_v12 }
 0x1a2   :  { %560 = vst.msk [vmem:[%s1366_s5 + $0x20] sm:$0xff] %vm555_vm6, %v520_v27 }
 0x1a5   :  { %v510_v4 = vpop.f32.mrf.mxu0 }
 0x1a6   :  { %v543_v63 = vpop.f32.mrf.mxu3  ;;  %v511_v3 = vadd.f32 %v601_v52, %v510_v4 }
 0x1a7   :  { %v544_v57 = vadd.f32 %v601_v52, %v543_v63 }
 0x1a8   :  { %557 = vst.msk [vmem:[%s1366_s5 + $0x8] sm:$0xff] %vm555_vm6, %v511_v3 }
 0x1a9   :  { %568 = vst.msk [vmem:[%s1366_s5 + $0x60] sm:$0xff] %vm555_vm6, %v544_v57  ;;  %v522_v17 = vpop.f32.mrf.mxu1 }
 0x1aa   :  { %v523_v46 = vadd.f32 %v601_v52, %v522_v17 }
 0x1ac   :  { %561 = vst.msk [vmem:[%s1366_s5 + $0x28] sm:$0xff] %vm555_vm6, %v523_v46 }
 0x1ad   :  { %v534_v53 = vpop.f32.mrf.mxu2 }
 0x1ae   :  { %v535_v19 = vadd.f32 %v601_v52, %v534_v53  ;;  %v546_v26 = vpop.f32.mrf.mxu3  ;;  %v513_v31 = vpop.f32.mrf.mxu0 }
 0x1af   :  { %v547_v7 = vadd.f32 %v601_v52, %v546_v26  ;;  %v514_v23 = vadd.f32 %v601_v52, %v513_v31 }
 0x1b0   :  { %565 = vst.msk [vmem:[%s1366_s5 + $0x48] sm:$0xff] %vm555_vm6, %v535_v19 }
 0x1b1   :  { %569 = vst.msk [vmem:[%s1366_s5 + $0x68] sm:$0xff] %vm555_vm6, %v547_v7  ;;  %v525_v5 = vpop.f32.mrf.mxu1 }
 0x1b2   :  { %558 = vst.msk [vmem:[%s1366_s5 + $0x10] sm:$0xff] %vm555_vm6, %v514_v23  ;;  %v526_v59 = vadd.f32 %v601_v52, %v525_v5 }
 0x1b4   :  { %562 = vst.msk [vmem:[%s1366_s5 + $0x30] sm:$0xff] %vm555_vm6, %v526_v59 }
 0x1b5   :  { %v537_v58 = vpop.f32.mrf.mxu2 }
 0x1b6   :  { %v538_v33 = vadd.f32 %v601_v52, %v537_v58  ;;  %v549_v22 = vpop.f32.mrf.mxu3  ;;  %v516_v8 = vpop.f32.mrf.mxu0 }
 0x1b7   :  { %v550_v15 = vadd.f32 %v601_v52, %v549_v22  ;;  %v517_v13 = vadd.f32 %v601_v52, %v516_v8 }
 0x1b8   :  { %566 = vst.msk [vmem:[%s1366_s5 + $0x50] sm:$0xff] %vm555_vm6, %v538_v33 }
 0x1b9   :  { %570 = vst.msk [vmem:[%s1366_s5 + $0x70] sm:$0xff] %vm555_vm6, %v550_v15  ;;  %v528_v43 = vpop.f32.mrf.mxu1 }
 0x1ba   :  { %559 = vst.msk [vmem:[%s1366_s5 + $0x18] sm:$0xff] %vm555_vm6, %v517_v13  ;;  %v529_v0 = vadd.f32 %v601_v52, %v528_v43 }
 0x1bc   :  { %563 = vst.msk [vmem:[%s1366_s5 + $0x38] sm:$0xff] %vm555_vm6, %v529_v0 }
 0x1bd   :  { %v540_v29 = vpop.f32.mrf.mxu2 }
 0x1be   :  { %v541_v9 = vadd.f32 %v601_v52, %v540_v29  ;;  %v552_v41 = vpop.f32.mrf.mxu3 }
 0x1bf   :  { %v553_v50 = vadd.f32 %v601_v52, %v552_v41 }
 0x1c0   :  { %567 = vst.msk [vmem:[%s1366_s5 + $0x58] sm:$0xff] %vm555_vm6, %v541_v9 }
 0x1c1   :  { %571 = vst.msk [vmem:[%s1366_s5 + $0x78] sm:$0xff] %vm555_vm6, %v553_v50 }

</bundles_post_ra>
